<compile_context>
chip_gen: v5e
topology: v5e:2x2
jax: 0.10.0
libtpu: 0.0.40
codegen_flags: <defaults>
</compile_context>

<pallas_src>
from functools import partial

import jax
import jax.numpy as jnp
from jax import lax
from jax.experimental import pallas as pl
from jax.experimental.pallas import tpu as pltpu


# ----------------------------- Pallas kernel --------------------------------

def fused_self_attention_kernel(v_ref, k_ref, q_ref, bias_ref,
                                wv_ref, wk_ref, wq_ref, wo_ref, bo_ref,
                                o_ref, *, heads, nb, lq, lk, lv, d):
    """One batch-block (nb batch elements) per grid step, all heads fused.

    v_ref/k_ref/q_ref : (nb*L, E)   natural layout, bf16; E = heads*d on lanes
    bias_ref          : (nb, Lq, Lk) f32 additive mask bias (0 / -1e20)
    wv/wk/wq_ref      : (E, E)       block-diagonal per-head weights, (in,out),
                                     bf16; wq pre-scaled by 1/sqrt(E)
    wo_ref            : (E, E)       Wout^T, bf16
    bo_ref            : (1, E)       f32
    o_ref             : (nb*Lq, E)   f32 lane-dense output block
    """
    compute_dtype = v_ref.dtype

    # Projections: batch folded into M rows, heads folded into lanes via the
    # block-diagonal weights -> exactly one MXU dot per projection.
    vp = jnp.dot(v_ref[...], wv_ref[...],
                 preferred_element_type=jnp.float32).astype(compute_dtype)
    kp = jnp.dot(k_ref[...], wk_ref[...],
                 preferred_element_type=jnp.float32).astype(compute_dtype)
    qp = jnp.dot(q_ref[...], wq_ref[...],          # 1/sqrt(E) already folded in
                 preferred_element_type=jnp.float32).astype(compute_dtype)

    # TODO(synk): at production Lq/Lk/heads replace this static unroll with a
    # flash-style Lk-tiled online softmax inside lax.fori_loop (bounds vreg
    # live ranges; required before scaling seq length on v7x's 64 MiB VMEM).
    ctx_rows = []
    for b in range(nb):
        bias_b = bias_ref[b]                       # (Lq, Lk) f32, head-invariant
        head_ctx = []
        for h in range(heads):
            qh = qp[b * lq:(b + 1) * lq, h * d:(h + 1) * d]   # (Lq, d)
            kh = kp[b * lk:(b + 1) * lk, h * d:(h + 1) * d]   # (Lk, d)
            vh = vp[b * lv:(b + 1) * lv, h * d:(h + 1) * d]   # (Lv, d)

            # Q @ K^T without a transpose: contract the last dims directly.
            energy = lax.dot_general(qh, kh, (((1,), (1,)), ((), ())),
                                     preferred_element_type=jnp.float32)
            energy = energy + bias_b               # additive mask, no select

            # Softmax in f32 (max-subtracted, so fully-masked rows stay finite
            # and match the reference's uniform behaviour).
            m = jnp.max(energy, axis=-1, keepdims=True)
            p = jnp.exp(energy - m)
            denom = jnp.sum(p, axis=-1, keepdims=True)
            attn = (p * pl.reciprocal(denom, approx=True)).astype(compute_dtype)

            head_ctx.append(jnp.dot(attn, vh,
                                    preferred_element_type=jnp.float32)
                            .astype(compute_dtype))            # (Lq, d)

        ctx_rows.append(head_ctx[0] if heads == 1
                        else jnp.concatenate(head_ctx, axis=-1))  # (Lq, E)

    ctx_all = ctx_rows[0] if nb == 1 else jnp.concatenate(ctx_rows, axis=0)

    # Head concat + batch fold feed ONE output-FC dot; bias fused in the store.
    o_ref[...] = (jnp.dot(ctx_all, wo_ref[...],
                          preferred_element_type=jnp.float32) + bo_ref[...])


# ------------------------------ wrapper --------------------------------------

def self_attention(values, keys, query, mask, params, embed_size, heads,
                   compute_dtype=jnp.bfloat16):
    N, Lv, E = values.shape
    Lk = keys.shape[1]
    Lq = query.shape[1]
    D = embed_size // heads
    assert D * heads == embed_size and E == embed_size

    # <=2 parallel grid blocks: feeds both of v7x's TensorCores while adding at
    # most one ~0.35us serial step on single-TC v5e/v6e; batch is folded into
    # the matmul M dimension inside each block.
    num_blocks = 2 if (N >= 2 and N % 2 == 0) else 1
    NB = N // num_blocks

    scale = 1.0 / float(embed_size) ** 0.5

    def block_diag_heads(w_t):      # (D, D) -> (E, E), one copy per head
        return jnp.kron(jnp.eye(heads, dtype=w_t.dtype), w_t)

    # Trace-time weight prep: transpose to (in, out), fold the softmax scale
    # into Wq, expand per-head weights to block-diagonal form, cast to bf16.
    wv_bd = block_diag_heads(params["Wv"].T).astype(compute_dtype)
    wk_bd = block_diag_heads(params["Wk"].T).astype(compute_dtype)
    wq_bd = block_diag_heads(params["Wq"].T * scale).astype(compute_dtype)
    wo_t = params["Wout"].T.astype(compute_dtype)            # (E, E)
    bo = params["bout"].reshape(1, E).astype(jnp.float32)

    # Natural layout, free row-major reshapes (no HBM transpose of Q/K/V).
    v2 = values.reshape(N * Lv, E).astype(compute_dtype)
    k2 = keys.reshape(N * Lk, E).astype(compute_dtype)
    q2 = query.reshape(N * Lq, E).astype(compute_dtype)

    # Additive bias computed once at trace time; replaces the per-head
    # in-kernel compare+select. Mask: (N, 1, Lq, Lk) or (N, Lq, Lk), 1=attend.
    mask3 = mask[:, 0] if mask.ndim == 4 else mask
    bias = jnp.where(mask3 == 0, jnp.float32(-1e20), jnp.float32(0.0))

    kernel = partial(fused_self_attention_kernel, heads=heads, nb=NB,
                     lq=Lq, lk=Lk, lv=Lv, d=D)

    out2 = pl.pallas_call(
        kernel,
        out_shape=jax.ShapeDtypeStruct((N * Lq, E), jnp.float32),
        grid=(num_blocks,),
        in_specs=[
            pl.BlockSpec((NB * Lv, E), lambda i: (i, 0)),
            pl.BlockSpec((NB * Lk, E), lambda i: (i, 0)),
            pl.BlockSpec((NB * Lq, E), lambda i: (i, 0)),
            pl.BlockSpec((NB, Lq, Lk), lambda i: (i, 0, 0)),
            pl.BlockSpec((E, E), lambda i: (0, 0)),
            pl.BlockSpec((E, E), lambda i: (0, 0)),
            pl.BlockSpec((E, E), lambda i: (0, 0)),
            pl.BlockSpec((E, E), lambda i: (0, 0)),
            pl.BlockSpec((1, E), lambda i: (0, 0)),
        ],
        # NOTE: at production embed sizes keep E a multiple of 128 so this
        # output block stays lane-dense (unmasked vst path).
        out_specs=pl.BlockSpec((NB * Lq, E), lambda i: (i, 0)),
        compiler_params=pltpu.CompilerParams(
            dimension_semantics=("parallel",)),
    )(v2, k2, q2, bias, wv_bd, wk_bd, wq_bd, wo_t, bo)

    return out2.reshape(N, Lq, E)


# ------------------------------ pure-JAX reference ---------------------------

def self_attention_ref(values, keys, query, mask, params, embed_size, heads):
    N, Lv, E = values.shape
    Lk, Lq = keys.shape[1], query.shape[1]
    D = embed_size // heads
    v = values.reshape(N, Lv, heads, D)
    k = keys.reshape(N, Lk, heads, D)
    q = query.reshape(N, Lq, heads, D)
    vp = jnp.einsum("nlhd,ed->nlhe", v, params["Wv"])
    kp = jnp.einsum("nlhd,ed->nlhe", k, params["Wk"])
    qp = jnp.einsum("nlhd,ed->nlhe", q, params["Wq"])
    energy = jnp.einsum("nqhd,nkhd->nhqk", qp, kp)
    energy = jnp.where(mask == 0, -1e20, energy)
    attn = jax.nn.softmax(energy / (embed_size ** 0.5), axis=3)
    out = jnp.einsum("nhql,nlhd->nqhd", attn, vp).reshape(N, Lq, E)
    return jnp.einsum("nqe,fe->nqf", out, params["Wout"]) + params["bout"]


# --------------------------------- main --------------------------------------

if __name__ == "__main__":
    embed_size, heads = 32, 2
    N, L = 2, 8                       # batch, seq_len (value_len=key_len=query_len)
    D = embed_size // heads

    key = jax.random.PRNGKey(0)
    k_v, k_k, k_q, k_wv, k_wk, k_wq, k_wo, k_bo = jax.random.split(key, 8)

    values = jax.random.normal(k_v, (N, L, embed_size), dtype=jnp.float32)
    keys_in = jax.random.normal(k_k, (N, L, embed_size), dtype=jnp.float32)
    query = jax.random.normal(k_q, (N, L, embed_size), dtype=jnp.float32)

    # causal mask, broadcast over heads: (N, 1, Lq, Lk), 1 = attend, 0 = masked
    mask = jnp.broadcast_to(
        jnp.tril(jnp.ones((L, L), dtype=jnp.float32))[None, None], (N, 1, L, L))

    params = {
        "Wv": 0.1 * jax.random.normal(k_wv, (D, D), dtype=jnp.float32),
        "Wk": 0.1 * jax.random.normal(k_wk, (D, D), dtype=jnp.float32),
        "Wq": 0.1 * jax.random.normal(k_wq, (D, D), dtype=jnp.float32),
        "Wout": 0.1 * jax.random.normal(k_wo, (embed_size, embed_size), dtype=jnp.float32),
        "bout": 0.1 * jax.random.normal(k_bo, (embed_size,), dtype=jnp.float32),
    }

    out = self_attention(values, keys_in, query, mask, params, embed_size, heads)
    out = jax.block_until_ready(out)

    ref = self_attention_ref(values, keys_in, query, mask, params, embed_size, heads)
    assert out.shape == (N, L, embed_size)
    # Tolerance covers bf16 MXU operands + the EUP approximate reciprocal
    # (inference-grade; the f32 reference is the numerics ground truth).
    assert jnp.allclose(out, ref, rtol=2e-2, atol=2e-2), "mismatch vs reference"

    print("KERNEL_OK")
</pallas_src>

<mosaic_0001>
module attributes {stable_mosaic.version = 11 : i64} {
  func.func @fused_self_attention_kernel(%arg0: i32, %arg1: memref<8x32xbf16, #tpu.memory_space<vmem>>, %arg2: memref<8x32xbf16, #tpu.memory_space<vmem>>, %arg3: memref<8x32xbf16, #tpu.memory_space<vmem>>, %arg4: memref<1x8x8xf32, #tpu.memory_space<vmem>>, %arg5: memref<32x32xbf16, #tpu.memory_space<vmem>>, %arg6: memref<32x32xbf16, #tpu.memory_space<vmem>>, %arg7: memref<32x32xbf16, #tpu.memory_space<vmem>>, %arg8: memref<32x32xbf16, #tpu.memory_space<vmem>>, %arg9: memref<1x32xf32, #tpu.memory_space<vmem>>, %arg10: memref<8x32xf32, #tpu.memory_space<vmem>>) attributes {dimension_semantics = [#tpu.dimension_semantics<parallel>], iteration_bounds = array<i64: 2>, scalar_prefetch = 0 : i64, scratch_operands = 0 : i64, tpu.core_type = #tpu.core_type<tc>, window_params = [{transform_indices = @transform_0, window_bounds = array<i64: 8, 32>}, {transform_indices = @transform_1, window_bounds = array<i64: 8, 32>}, {transform_indices = @transform_2, window_bounds = array<i64: 8, 32>}, {transform_indices = @transform_3, window_bounds = array<i64: 1, 8, 8>}, {pipeline_mode = #tpu.pipeline_mode<synchronous>, transform_indices = @transform_4, window_bounds = array<i64: 32, 32>}, {pipeline_mode = #tpu.pipeline_mode<synchronous>, transform_indices = @transform_5, window_bounds = array<i64: 32, 32>}, {pipeline_mode = #tpu.pipeline_mode<synchronous>, transform_indices = @transform_6, window_bounds = array<i64: 32, 32>}, {pipeline_mode = #tpu.pipeline_mode<synchronous>, transform_indices = @transform_7, window_bounds = array<i64: 32, 32>}, {pipeline_mode = #tpu.pipeline_mode<synchronous>, transform_indices = @transform_8, window_bounds = array<i64: 1, 32>}, {transform_indices = @transform_9, window_bounds = array<i64: 8, 32>}]} {
    %c0 = arith.constant 0 : index
    %c0_0 = arith.constant 0 : index
    %0 = vector.load %arg1[%c0, %c0_0] : memref<8x32xbf16, #tpu.memory_space<vmem>>, vector<8x32xbf16>
    %c0_1 = arith.constant 0 : index
    %c0_2 = arith.constant 0 : index
    %1 = vector.load %arg5[%c0_1, %c0_2] : memref<32x32xbf16, #tpu.memory_space<vmem>>, vector<32x32xbf16>
    %cst = arith.constant dense<0.000000e+00> : vector<8x32xf32>
    %2 = tpu.matmul %0, %1, %cst {dimension_numbers = #tpu.dot_dimension_numbers<[1], [0], [0], [1], [0, 0, 1, 1], [], []>} : vector<8x32xbf16>, vector<32x32xbf16>, vector<8x32xf32> -> vector<8x32xf32>
    %3 = arith.truncf %2 : vector<8x32xf32> to vector<8x32xbf16>
    %c0_3 = arith.constant 0 : index
    %c0_4 = arith.constant 0 : index
    %4 = vector.load %arg2[%c0_3, %c0_4] : memref<8x32xbf16, #tpu.memory_space<vmem>>, vector<8x32xbf16>
    %c0_5 = arith.constant 0 : index
    %c0_6 = arith.constant 0 : index
    %5 = vector.load %arg6[%c0_5, %c0_6] : memref<32x32xbf16, #tpu.memory_space<vmem>>, vector<32x32xbf16>
    %cst_7 = arith.constant dense<0.000000e+00> : vector<8x32xf32>
    %6 = tpu.matmul %4, %5, %cst_7 {dimension_numbers = #tpu.dot_dimension_numbers<[1], [0], [0], [1], [0, 0, 1, 1], [], []>} : vector<8x32xbf16>, vector<32x32xbf16>, vector<8x32xf32> -> vector<8x32xf32>
    %7 = arith.truncf %6 : vector<8x32xf32> to vector<8x32xbf16>
    %c0_8 = arith.constant 0 : index
    %c0_9 = arith.constant 0 : index
    %8 = vector.load %arg3[%c0_8, %c0_9] : memref<8x32xbf16, #tpu.memory_space<vmem>>, vector<8x32xbf16>
    %c0_10 = arith.constant 0 : index
    %c0_11 = arith.constant 0 : index
    %9 = vector.load %arg7[%c0_10, %c0_11] : memref<32x32xbf16, #tpu.memory_space<vmem>>, vector<32x32xbf16>
    %cst_12 = arith.constant dense<0.000000e+00> : vector<8x32xf32>
    %10 = tpu.matmul %8, %9, %cst_12 {dimension_numbers = #tpu.dot_dimension_numbers<[1], [0], [0], [1], [0, 0, 1, 1], [], []>} : vector<8x32xbf16>, vector<32x32xbf16>, vector<8x32xf32> -> vector<8x32xf32>
    %11 = arith.truncf %10 : vector<8x32xf32> to vector<8x32xbf16>
    %c0_13 = arith.constant 0 : index
    %c0_14 = arith.constant 0 : index
    %c0_15 = arith.constant 0 : index
    %12 = vector.load %arg4[%c0_13, %c0_14, %c0_15] : memref<1x8x8xf32, #tpu.memory_space<vmem>>, vector<1x8x8xf32>
    %13 = vector.shape_cast %12 : vector<1x8x8xf32> to vector<8x8xf32>
    %14 = vector.extract_strided_slice %11 {offsets = [0, 0], sizes = [8, 16], strides = [1, 1]} : vector<8x32xbf16> to vector<8x16xbf16>
    %15 = vector.extract_strided_slice %7 {offsets = [0, 0], sizes = [8, 16], strides = [1, 1]} : vector<8x32xbf16> to vector<8x16xbf16>
    %16 = vector.extract_strided_slice %3 {offsets = [0, 0], sizes = [8, 16], strides = [1, 1]} : vector<8x32xbf16> to vector<8x16xbf16>
    %cst_16 = arith.constant dense<0.000000e+00> : vector<8x8xf32>
    %17 = tpu.matmul %14, %15, %cst_16 {dimension_numbers = #tpu.dot_dimension_numbers<[1], [1], [0], [0], [0, 0, 1, 0], [], []>} : vector<8x16xbf16>, vector<8x16xbf16>, vector<8x8xf32> -> vector<8x8xf32>
    %18 = arith.addf %17, %13 : vector<8x8xf32>
    %cst_17 = arith.constant dense<0xFF800000> : vector<8xf32>
    %19 = vector.multi_reduction <maximumf>, %18, %cst_17 [1] : vector<8x8xf32> to vector<8xf32>
    %20 = vector.shape_cast %19 : vector<8xf32> to vector<8x1xf32>
    %21 = vector.broadcast %20 : vector<8x1xf32> to vector<8x8xf32>
    %22 = arith.subf %18, %21 : vector<8x8xf32>
    %23 = math.exp %22 : vector<8x8xf32>
    %cst_18 = arith.constant dense<0.000000e+00> : vector<8xf32>
    %24 = vector.multi_reduction <add>, %23, %cst_18 [1] : vector<8x8xf32> to vector<8xf32>
    %25 = vector.shape_cast %24 : vector<8xf32> to vector<8x1xf32>
    %26 = tpu.reciprocal %25 {approx = true} : vector<8x1xf32> -> vector<8x1xf32>
    %27 = vector.broadcast %26 : vector<8x1xf32> to vector<8x8xf32>
    %28 = arith.mulf %23, %27 : vector<8x8xf32>
    %29 = arith.truncf %28 : vector<8x8xf32> to vector<8x8xbf16>
    %cst_19 = arith.constant dense<0.000000e+00> : vector<8x16xf32>
    %30 = tpu.matmul %29, %16, %cst_19 {dimension_numbers = #tpu.dot_dimension_numbers<[1], [0], [0], [1], [0, 0, 1, 1], [], []>} : vector<8x8xbf16>, vector<8x16xbf16>, vector<8x16xf32> -> vector<8x16xf32>
    %31 = arith.truncf %30 : vector<8x16xf32> to vector<8x16xbf16>
    %32 = vector.extract_strided_slice %11 {offsets = [0, 16], sizes = [8, 16], strides = [1, 1]} : vector<8x32xbf16> to vector<8x16xbf16>
    %33 = vector.extract_strided_slice %7 {offsets = [0, 16], sizes = [8, 16], strides = [1, 1]} : vector<8x32xbf16> to vector<8x16xbf16>
    %34 = vector.extract_strided_slice %3 {offsets = [0, 16], sizes = [8, 16], strides = [1, 1]} : vector<8x32xbf16> to vector<8x16xbf16>
    %cst_20 = arith.constant dense<0.000000e+00> : vector<8x8xf32>
    %35 = tpu.matmul %32, %33, %cst_20 {dimension_numbers = #tpu.dot_dimension_numbers<[1], [1], [0], [0], [0, 0, 1, 0], [], []>} : vector<8x16xbf16>, vector<8x16xbf16>, vector<8x8xf32> -> vector<8x8xf32>
    %36 = arith.addf %35, %13 : vector<8x8xf32>
    %cst_21 = arith.constant dense<0xFF800000> : vector<8xf32>
    %37 = vector.multi_reduction <maximumf>, %36, %cst_21 [1] : vector<8x8xf32> to vector<8xf32>
    %38 = vector.shape_cast %37 : vector<8xf32> to vector<8x1xf32>
    %39 = vector.broadcast %38 : vector<8x1xf32> to vector<8x8xf32>
    %40 = arith.subf %36, %39 : vector<8x8xf32>
    %41 = math.exp %40 : vector<8x8xf32>
    %cst_22 = arith.constant dense<0.000000e+00> : vector<8xf32>
    %42 = vector.multi_reduction <add>, %41, %cst_22 [1] : vector<8x8xf32> to vector<8xf32>
    %43 = vector.shape_cast %42 : vector<8xf32> to vector<8x1xf32>
    %44 = tpu.reciprocal %43 {approx = true} : vector<8x1xf32> -> vector<8x1xf32>
    %45 = vector.broadcast %44 : vector<8x1xf32> to vector<8x8xf32>
    %46 = arith.mulf %41, %45 : vector<8x8xf32>
    %47 = arith.truncf %46 : vector<8x8xf32> to vector<8x8xbf16>
    %cst_23 = arith.constant dense<0.000000e+00> : vector<8x16xf32>
    %48 = tpu.matmul %47, %34, %cst_23 {dimension_numbers = #tpu.dot_dimension_numbers<[1], [0], [0], [1], [0, 0, 1, 1], [], []>} : vector<8x8xbf16>, vector<8x16xbf16>, vector<8x16xf32> -> vector<8x16xf32>
    %49 = arith.truncf %48 : vector<8x16xf32> to vector<8x16xbf16>
    %50 = tpu.concatenate %31, %49 in 1 : vector<8x16xbf16>, vector<8x16xbf16> -> vector<8x32xbf16>
    %c0_24 = arith.constant 0 : index
    %c0_25 = arith.constant 0 : index
    %51 = vector.load %arg8[%c0_24, %c0_25] : memref<32x32xbf16, #tpu.memory_space<vmem>>, vector<32x32xbf16>
    %cst_26 = arith.constant dense<0.000000e+00> : vector<8x32xf32>
    %52 = tpu.matmul %50, %51, %cst_26 {dimension_numbers = #tpu.dot_dimension_numbers<[1], [0], [0], [1], [0, 0, 1, 1], [], []>} : vector<8x32xbf16>, vector<32x32xbf16>, vector<8x32xf32> -> vector<8x32xf32>
    %c0_27 = arith.constant 0 : index
    %c0_28 = arith.constant 0 : index
    %53 = vector.load %arg9[%c0_27, %c0_28] : memref<1x32xf32, #tpu.memory_space<vmem>>, vector<1x32xf32>
    %54 = vector.broadcast %53 : vector<1x32xf32> to vector<8x32xf32>
    %55 = arith.addf %52, %54 : vector<8x32xf32>
    %c0_29 = arith.constant 0 : index
    %c0_30 = arith.constant 0 : index
    %56 = vector.load %arg10[%c0_29, %c0_30] : memref<8x32xf32, #tpu.memory_space<vmem>>, vector<8x32xf32>
    tpu.vector_store %arg10[%c0_29, %c0_30], %55 {strides = array<i32>} : memref<8x32xf32, #tpu.memory_space<vmem>>, vector<8x32xf32>,
    return
  }
  func.func @transform_0(%arg0: i32) -> (i32, i32) {
    %c0_i32 = arith.constant 0 : i32
    %c0_i32_0 = arith.constant 0 : i32
    return %arg0, %c0_i32 : i32, i32
  }
  func.func @transform_1(%arg0: i32) -> (i32, i32) {
    %c0_i32 = arith.constant 0 : i32
    %c0_i32_0 = arith.constant 0 : i32
    return %arg0, %c0_i32 : i32, i32
  }
  func.func @transform_2(%arg0: i32) -> (i32, i32) {
    %c0_i32 = arith.constant 0 : i32
    %c0_i32_0 = arith.constant 0 : i32
    return %arg0, %c0_i32 : i32, i32
  }
  func.func @transform_3(%arg0: i32) -> (i32, i32, i32) {
    %c0_i32 = arith.constant 0 : i32
    %c0_i32_0 = arith.constant 0 : i32
    %c0_i32_1 = arith.constant 0 : i32
    return %arg0, %c0_i32, %c0_i32_0 : i32, i32, i32
  }
  func.func @transform_4(%arg0: i32) -> (i32, i32) {
    %c0_i32 = arith.constant 0 : i32
    %c0_i32_0 = arith.constant 0 : i32
    %c0_i32_1 = arith.constant 0 : i32
    return %c0_i32, %c0_i32_0 : i32, i32
  }
  func.func @transform_5(%arg0: i32) -> (i32, i32) {
    %c0_i32 = arith.constant 0 : i32
    %c0_i32_0 = arith.constant 0 : i32
    %c0_i32_1 = arith.constant 0 : i32
    return %c0_i32, %c0_i32_0 : i32, i32
  }
  func.func @transform_6(%arg0: i32) -> (i32, i32) {
    %c0_i32 = arith.constant 0 : i32
    %c0_i32_0 = arith.constant 0 : i32
    %c0_i32_1 = arith.constant 0 : i32
    return %c0_i32, %c0_i32_0 : i32, i32
  }
  func.func @transform_7(%arg0: i32) -> (i32, i32) {
    %c0_i32 = arith.constant 0 : i32
    %c0_i32_0 = arith.constant 0 : i32
    %c0_i32_1 = arith.constant 0 : i32
    return %c0_i32, %c0_i32_0 : i32, i32
  }
  func.func @transform_8(%arg0: i32) -> (i32, i32) {
    %c0_i32 = arith.constant 0 : i32
    %c0_i32_0 = arith.constant 0 : i32
    %c0_i32_1 = arith.constant 0 : i32
    return %c0_i32, %c0_i32_0 : i32, i32
  }
  func.func @transform_9(%arg0: i32) -> (i32, i32) {
    %c0_i32 = arith.constant 0 : i32
    %c0_i32_0 = arith.constant 0 : i32
    return %arg0, %c0_i32 : i32, i32
  }
}

</mosaic_0001>

<bundles_post_ra>
// kernel: tpu_custom_call.1
= control target key start
LH: loop header
LB: loop body
LE: loop exit
PB: predicated region body
PF: predicated region fallthrough
CT: control target
= control target key end

     0   :  { %s1864_s0 = inlined_call_operand.hbm [shape: bf16[16,32], index: 0, kind: input, shape index: {}]   ;;  %s1865_s1 = inlined_call_operand.hbm [shape: bf16[16,32], index: 1, kind: input, shape index: {}]   ;;  %s1866_s2 = inlined_call_operand.hbm [shape: bf16[16,32], index: 2, kind: input, shape index: {}]   ;;  %s1867_s3 = inlined_call_operand.hbm [shape: f32[2,8,8], index: 3, kind: input, shape index: {}]   ;;  %s1868_s4 = inlined_call_operand.hbm [shape: bf16[32,32], index: 4, kind: input, shape index: {}]   ;;  %s1869_s5 = inlined_call_operand.hbm [shape: bf16[32,32], index: 5, kind: input, shape index: {}]   ;;  %s1870_s6 = inlined_call_operand.hbm [shape: bf16[32,32], index: 6, kind: input, shape index: {}]   ;;  %s1871_s7 = inlined_call_operand.hbm [shape: bf16[32,32], index: 7, kind: input, shape index: {}]   ;;  %s1872_s8 = inlined_call_operand.vmem [shape: f32[1,32], index: 8, kind: input, shape index: {}]   ;;  %s1873_s9 = inlined_call_operand.hbm [shape: f32[16,32], index: 9, kind: output, shape index: {}]  }
   0x1   :  { %1885 = sst [smem:[#allocation29_spill]] %s1865_s1 }
   0x2   :  { %1886 = sst [smem:[#allocation30_spill]] %s1868_s4 }
   0x3   :  { %1887 = sst [smem:[#allocation31_spill]] %s1869_s5 }
   0x4   :  { %1888 = sst [smem:[#allocation32_spill]] %s1870_s6 }
   0x5   :  { %1889 = sst [smem:[#allocation33_spill]] %s1871_s7 }
   0x6   :  { %14 = vsyncpa [#allocation3], 0 }
   0x7   :  { %16 = vsyncpa [#allocation3 + $0x1], 0 }
   0x8   :  { %17 = vsyncpa [#allocation6], 0 }
   0x9   :  { %19 = vsyncpa [#allocation6 + $0x1], 0 }
   0xa   :  { %20 = vsyncpa [#allocation9], 0 }
   0xb   :  { %22 = vsyncpa [#allocation9 + $0x1], 0 }
   0xc   :  { %23 = vsyncpa [#allocation12], 0 }
   0xd   :  { %24 = vsyncpa [#allocation15], 0 }
   0xe   :  { %25 = vsyncpa [#allocation4], 0 }
   0xf   :  { %27 = vsyncpa [#allocation4 + $0x1], 0  ;;  %s1567_s30 = smov 0   ;;  %s1569_s10 = smov 0  }
  0x10   :  { %s1571_s11 = smov 0   ;;  %s1573_s12 = smov 0  }
  0x11 LB: > { %1890 = sst [smem:[#allocation24_spill]] %s1495_s30  ;;  %s1588_s13 = sadd.s32 4294967295, %s1507_s12   ;;  %s1507_s12 = sphi %s1573_s12, %s1918_s12   ;;  %s1503_s11 = sphi %s1571_s11, %s1920_s11   ;;  %s1499_s10 = sphi %s1569_s10, %s1922_s10   ;;  %s1495_s30 = sphi %s1567_s30, %s1921_s30  }
  0x12   : > { %1891 = sst [smem:[#allocation25_spill]] %s1503_s11  ;;  %s989_s14 = sadd.s32 4294967294, %s1507_s12  }
  0x13   : > { %p53_p0 = scmp.ne.s32.totalorder %s1499_s10, %s1495_s30  ;;  %p1882_p1 = scmp.eq.s32.totalorder %s1588_s13, 0 }
  0x14   : > { %p260_p2 = scmp.eq.s32.totalorder %s1588_s13, 1  ;;  %p266_p3 = scmp.eq.s32.totalorder %s989_s14, 1 }
  0x15   : > { %p1597_p4 = por %p1882_p1, %p53_p0  ;;  %p990_p5 = scmp.ge.s32.totalorder %s1507_s12, 1 }
  0x16   : > { %p1602_p6 = por %p266_p3, %p53_p0  ;;  %p273_p7 = scmp.lt.s32.totalorder %s1507_s12, 3 }
  0x17   : > { %s1895_s4 = sld [smem:[#allocation30_spill]]  ;;  %s1509_s21 = smov [#allocation10]  }
  0x18   : > { %s1893_s16 = scalar_select %p1602_p6, 1, 0 }
  0x19   : > { %p1610_p8 = pnand %p990_p5, %p273_p7  ;;  %s286_s22 = sshll.u32 %s1509_s21, 4  ;;  %s287_s22 = int_to_ptr.vmem [resolvable:$true] %s286_s22 }
  0x1a   : > { %1894 = sst [smem:[#allocation26_spill]] %s1893_s16  ;;  %s1874_s27 = smov 64  }
  0x1b   : > { %p1092_p9 = pneg %p1610_p8  ;;  %s1898_s5 = sld [smem:[#allocation31_spill]] }
  0x1c   : > { %s1876_s28 = smov 4   ;;  %s1512_s29 = smov [#allocation11]  }
  0x1d   : > { %s284_s19 = sshll.u32 %s1895_s4, 4  ;;  %p1618_p10 = pnand %p1092_p9, %p1882_p1  ;;  %s285_s19 = int_to_ptr.hbm [resolvable:$true] %s284_s19 }
  0x1e   : > { %s300_s14 = sshll.u32 %s1512_s29, 4  ;;  %s1637_s17 = sadd.s32 1, %s1507_s12   ;;  %s301_s14 = int_to_ptr.vmem [resolvable:$true] %s300_s14 }
  0x1f   : > { %1095 = dma.hbm_to_vmem [thread:$0]  (!%p1618_p10), %s285_s19, 256, %s287_s22, [#allocation9], %s1874_s27, %s1874_s27, %s1876_s28  }
  0x20   : > { %1899 = sst [smem:[#allocation27_spill]] %s1637_s17  ;;  %s40_s18 = sadd.s32 1, %s1503_s11 }
  0x21   : > { %s298_s26 = sshll.u32 %s1898_s5, 4  ;;  %s37_s21 = ssub.s32 %s1507_s12, %s1637_s17  ;;  %s299_s26 = int_to_ptr.hbm [resolvable:$true] %s298_s26 }
  0x22   : > { %1098 = dma.hbm_to_vmem [thread:$0]  (!%p1618_p10), %s299_s26, 256, %s301_s14, [#allocation12], %s1874_s27, %s1874_s27, %s1876_s28  }
  0x23   : > { %p47_p12 = scmp.ne.s32.totalorder %s1503_s11, %s1499_s10  ;;  %p38_p13 = scmp.eq.s32.totalorder %s37_s21, 0 }
  0x24   : > { %p48_p0 = scmp.eq.s32.totalorder %s1507_s12, 0  ;;  %p1126_p5 = scmp.lt.s32.totalorder %s1507_s12, 2 }
  0x25   : > { %p1647_p3 = por %p260_p2, %p47_p12  ;;  %s1656_s24 = sand.u32 1, %s1503_s11  }
  0x26   : > { %s1653_s22 = scalar_select %p38_p13, %s1503_s11, %s40_s18  }
  0x27   : > { %p49_p7 = por %p48_p0, %p47_p12  ;;  %s1659_s25 = sshll.u32 %s1656_s24, 2 }
  0x28   : > { %1901 = sst [smem:[#allocation28_spill]] %s1653_s22  ;;  %s1662_s26 = sshll.u32 %s1507_s12, 2 }
  0x29   : > { %p1664_p9 = pnand %p1126_p5, %p49_p7  ;;  %s1883_s14 = sand.u32 1, %s1507_s12  }
  0x2a   : > { %s1903_s1 = sld [smem:[#allocation29_spill]]  ;;  %s368_s4 = scalar_lea.vmem [#allocation5], %s1659_s25 }
  0x2b   : > { %s376_s5 = sshll.u32 %s368_s4, 4  ;;  %s1676_s22 = scalar_lea.sflag [#allocation6], %s1883_s14  ;;  %s377_s5 = int_to_ptr.vmem [resolvable:$true] %s376_s5 }
  0x2c   : > { %p1245_p12 = pneg %p1664_p9 }
  0x30   : > { %s372_s27 = scalar_lea.hbm %s1903_s1, %s1662_s26 }
  0x31   : > { %s374_s28 = sshll.u32 %s372_s27, 4  ;;  %s1248_s27 = scalar_lea.hbm %s1903_s1, 8  ;;  %s375_s28 = int_to_ptr.hbm [resolvable:$true] %s374_s28 }
  0x32   : > { %s1241_s11 = sshra.s32 %s375_s28, 4  ;;  %s1242_s11 = int_to_ptr.hbm [resolvable:$true] %s1241_s11 }
  0x33   : > { %s1243_s17 = scalar_lea.hbm %s1242_s11, 4  ;;  %p1249_p5 = scmp.lt.s32.totalorder %s1242_s11, %s1903_s1 }
  0x34   : > { %p1244_p2 = scmp.ne.s32.totalorder %s1242_s11, %s1243_s17  ;;  %p1250_p7 = scmp.lt.s32.totalorder %s1248_s27, %s1243_s17 }
  0x36   : > { %p1246_p13 = pnand %p1245_p12, %p1244_p2  ;;  %p1251_p11 = por %p1250_p7, %p1249_p5 }
  0x38   : > { %p1247_p0 = pneg %p1246_p13 }
  0x3a   : > { %p1252_p1 = pnand %p1251_p11, %p1247_p0 }
  0x3c   : > { %1255 = shalt.err (!%p1252_p1)
}
  0x3d   : > { %1111 = dma.hbm_to_vmem [thread:$0]  (!%p1664_p9), %s375_s28, 64, %s377_s5, %s1676_s22  }
  0x3e   : > { %s1904_s6 = sld [smem:[#allocation32_spill]]  ;;  %s1513_s18 = smov [#allocation13]  }
  0x3f   : > { %s314_s11 = sshll.u32 %s1513_s18, 4  ;;  %s1905_s7 = sld [smem:[#allocation33_spill]]  ;;  %s315_s11 = int_to_ptr.vmem [resolvable:$true] %s314_s11 }
  0x40   : > { %s1906_s4 = smov 4   ;;  %s1907_s1 = smov 64  }
  0x41   : > { %s1514_s5 = smov [#allocation14]   ;;  %s349_s16 = scalar_lea.vmem [#allocation2], %s1659_s25 }
  0x42   : > { %s328_s28 = sshll.u32 %s1514_s5, 4  ;;  %s357_s17 = sshll.u32 %s349_s16, 4  ;;  %s329_s28 = int_to_ptr.vmem [resolvable:$true] %s328_s28  ;;  %s358_s17 = int_to_ptr.vmem [resolvable:$true] %s357_s17 }
  0x43   : > { %s1338_s30 = scalar_lea.hbm %s1864_s0, 8 }
  0x44   : > { %s312_s21 = sshll.u32 %s1904_s6, 4  ;;  %s353_s6 = scalar_lea.hbm %s1864_s0, %s1662_s26  ;;  %s313_s21 = int_to_ptr.hbm [resolvable:$true] %s312_s21 }
  0x45   : > { %s326_s27 = sshll.u32 %s1905_s7, 4  ;;  %s355_s18 = sshll.u32 %s353_s6, 4  ;;  %s327_s27 = int_to_ptr.hbm [resolvable:$true] %s326_s27  ;;  %s356_s18 = int_to_ptr.hbm [resolvable:$true] %s355_s18 }
  0x46   : > { %1101 = dma.hbm_to_vmem [thread:$0]  (!%p1618_p10), %s313_s21, 256, %s315_s11, [#allocation12], %s1907_s1, %s1907_s1, %s1906_s4  }
  0x47   : > { %1104 = dma.hbm_to_vmem [thread:$0]  (!%p1618_p10), %s327_s27, 256, %s329_s28, [#allocation15], %s1907_s1, %s1907_s1, %s1906_s4  }
  0x48   : > { %s346_s7 = scalar_lea.sflag [#allocation3], %s1656_s24  ;;  %s1331_s21 = sshra.s32 %s356_s18, 4  ;;  %s1332_s21 = int_to_ptr.hbm [resolvable:$true] %s1331_s21 }
  0x49   : > { %s1333_s11 = scalar_lea.hbm %s1332_s21, 4  ;;  %p1339_p10 = scmp.lt.s32.totalorder %s1332_s21, %s1864_s0 }
  0x4a   : > { %p1334_p1 = scmp.ne.s32.totalorder %s1332_s21, %s1333_s11  ;;  %p1340_p13 = scmp.lt.s32.totalorder %s1338_s30, %s1333_s11 }
  0x4c   : > { %p1336_p11 = pnand %p1334_p1, %p1245_p12  ;;  %p1341_p0 = por %p1340_p13, %p1339_p10 }
  0x4e   : > { %p1337_p2 = pneg %p1336_p11 }
  0x50   : > { %p1342_p5 = pnand %p1341_p0, %p1337_p2 }
  0x52   : > { %1345 = shalt.err (!%p1342_p5)
}
  0x53   : > { %1108 = dma.hbm_to_vmem [thread:$0]  (!%p1664_p9), %s356_s18, 64, %s358_s17, %s346_s7  }
  0x54   : > { %s391_s4 = scalar_lea.hbm %s1866_s2, %s1662_s26  ;;  %s387_s16 = scalar_lea.vmem [#allocation7], %s1659_s25 }
  0x55   : > { %s393_s28 = sshll.u32 %s391_s4, 4  ;;  %s395_s5 = sshll.u32 %s387_s16, 4  ;;  %s394_s28 = int_to_ptr.hbm [resolvable:$true] %s393_s28  ;;  %s396_s5 = int_to_ptr.vmem [resolvable:$true] %s395_s5 }
  0x56   : > { %s1361_s21 = sshra.s32 %s394_s28, 4  ;;  %s1368_s7 = scalar_lea.hbm %s1866_s2, 8  ;;  %s1362_s21 = int_to_ptr.hbm [resolvable:$true] %s1361_s21 }
  0x57   : > { %s1363_s11 = scalar_lea.hbm %s1362_s21, 4  ;;  %p1369_p2 = scmp.lt.s32.totalorder %s1362_s21, %s1866_s2 }
  0x58   : > { %p1364_p7 = scmp.ne.s32.totalorder %s1362_s21, %s1363_s11  ;;  %p1370_p10 = scmp.lt.s32.totalorder %s1368_s7, %s1363_s11 }
  0x5a   : > { %p1366_p1 = pnand %p1364_p7, %p1245_p12  ;;  %p1371_p13 = por %p1370_p10, %p1369_p2 }
  0x5c   : > { %p1367_p11 = pneg %p1366_p1 }
  0x5e   : > { %p1372_p0 = pnand %p1371_p13, %p1367_p11 }
  0x60   : > { %1375 = shalt.err (!%p1372_p0)
}
  0x61   : > { %1114 = dma.hbm_to_vmem [thread:$0]  (!%p1664_p9), %s394_s28, 64, %s396_s5, %s1676_s22  }
  0x62   : > { %s1002_s25 = sshll.u32 %s1656_s24, 3  ;;  %s1003_s26 = sshll.u32 %s1507_s12, 3 }
  0x63   : > { %s410_s6 = scalar_lea.hbm %s1867_s3, %s1003_s26  ;;  %s406_s4 = scalar_lea.vmem [#allocation8], %s1002_s25 }
  0x64   : > { %s412_s27 = sshll.u32 %s410_s6, 4  ;;  %s414_s16 = sshll.u32 %s406_s4, 4  ;;  %s413_s27 = int_to_ptr.hbm [resolvable:$true] %s412_s27  ;;  %s415_s16 = int_to_ptr.vmem [resolvable:$true] %s414_s16 }
  0x65   : > { %s1908_s21 = sand.u32 1, %s1507_s12   ;;  %s1391_s23 = sshra.s32 %s413_s27, 4  ;;  %s1392_s23 = int_to_ptr.hbm [resolvable:$true] %s1391_s23 }
  0x66   : > { %s403_s11 = scalar_lea.sflag [#allocation9], %s1908_s21  ;;  %s1393_s30 = scalar_lea.hbm %s1392_s23, 8 }
  0x67   : > { %p1394_p5 = scmp.ne.s32.totalorder %s1392_s23, %s1393_s30  ;;  %s1398_s28 = scalar_lea.hbm %s1867_s3, 16 }
  0x68   : > { %p1399_p11 = scmp.lt.s32.totalorder %s1392_s23, %s1867_s3  ;;  %p1400_p2 = scmp.lt.s32.totalorder %s1398_s28, %s1393_s30 }
  0x69   : > { %p1396_p7 = pnand %p1394_p5, %p1245_p12 }
  0x6a   : > { %p1401_p10 = por %p1400_p2, %p1399_p11 }
  0x6b   : > { %p1397_p1 = pneg %p1396_p7 }
  0x6d   : > { %p1402_p13 = pnand %p1401_p10, %p1397_p1 }
  0x6f   : > { %1405 = shalt.err (!%p1402_p13)
}
  0x70   : > { %1117 = dma.hbm_to_vmem [thread:$0]  (!%p1664_p9), %s413_s27, 128, %s415_s16, %s403_s11  }
  0x71   : > { %423 = sbr.rel (%p1610_p8) target bundleno = 1177 (0x499), region = 56  ;;  %s1763_s18 = sand.u32 (!%p1610_p8), 1, %s1499_s10  }
  0x72   : > { %s1766_s17 = sshll.u32 (!%p1610_p8), %s1763_s18, 2  ;;  %s426_s25 = scalar_lea.sflag (!%p1610_p8), [#allocation3], %s1763_s18 }
  0x73   : > { %s429_s26 = scalar_lea.vmem (!%p1610_p8), [#allocation2], %s1766_s17 }
  0x76   : > { %1466 = dma.done.wait (%p1597_p4), %s426_s25, 64  }
  0x77   : > { %1468 = vsyncadd (%p1597_p4), %s426_s25, 4294967232  ;;  %s435_s20 = sand.u32 1, %s1588_s13   ;;  %s439_s14 = scalar_lea.vmem [#allocation5], %s1766_s17 }
  0x78   : > { %s436_s29 = scalar_lea.sflag [#allocation6], %s435_s20 }
  0x79   : > { %1470 = dma.done.wait (%p1597_p4), %s436_s29, 128  }
  0x7a   : > { %1472 = vsyncadd (%p1597_p4), %s436_s29, 4294967168  ;;  %s1008_s1 = sshll.u32 %s1763_s18, 3  ;;  %s449_s6 = scalar_lea.vmem [#allocation7], %s1766_s17 }
  0x7b   : > { %s456_s27 = scalar_lea.sflag [#allocation9], %s435_s20  ;;  %s1784_s4 = scalar_lea.vmem [#allocation8], %s1008_s1 }
  0x7c   : > { %1474 = dma.done.wait (%p1597_p4), %s456_s27, 128  }
  0x7d   : > { %1476 = vsyncadd (%p1597_p4), %s456_s27, 4294967168  ;;  %p1909_p8 = scmp.eq.s32.totalorder %s1588_s13, 0 }
  0x7f   : > { %1478 = dma.done.wait (%p1909_p8), [#allocation9], 256   ;;  %p1910_p9 = pmov %p1909_p8 }
  0x80   : > { %p1911_p12 = pmov %p1909_p8 }
  0x81   : > { %1480 = vsyncadd (%p1910_p9), [#allocation9], 4294967040 }
  0x82   : > { %1482 = dma.done.wait (%p1911_p12), [#allocation12], 512   ;;  %p1912_p0 = pmov %p1909_p8 }
  0x84   : > { %1484 = vsyncadd (%p1912_p0), [#allocation12], 4294966784  ;;  %p1913_p5 = pmov %p1912_p0 }
  0x85   : > { %p1914_p7 = pmov %p1912_p0 }
  0x86   : > { %1486 = dma.done.wait (%p1913_p5), [#allocation15], 256  }
  0x87   : > { %1488 = vsyncadd (%p1914_p7), [#allocation15], 4294967040  ;;  %v1061_v0 = vld [vmem:[#allocation11 + $0x8] sm:$0xff]  ;;  %v1063_v1 = vld [vmem:[#allocation13 + $0x8] sm:$0xff]  ;;  %vm548_vm0 = vcmask 261120   ;;  %vm635_vm1 = vcmask 130048  }
  0x88   : > { %592 = vmatpush.bf16.msra.mxu1 %v1061_v0  ;;  %626 = vmatpush.bf16.msra.mxu2 %v1063_v1  ;;  %v1060_v2 = vld [vmem:[#allocation11] sm:$0xff]  ;;  %v1062_v3 = vld [vmem:[#allocation13] sm:$0xff]  ;;  %v600_v5 = vld [vmem:[%s449_s6] sm:$0xf]  ;;  %s1515_s15 = smov 112   ;;  %vm655_vm2 = vcmask 64512  }
  0x89   : > { %v566_v4 = vld [vmem:[%s439_s14] sm:$0xf]  ;;  %v1059_v22 = vld [vmem:[#allocation10 + $0x8] sm:$0xff]  ;;  %v531_v24 = vld [vmem:[%s429_s26] sm:$0xf]  ;;  %vm671_vm3 = vcmask 1043456  }
  0x8a   : > { %558 = vmatpush.bf16.msra.mxu0 %v1059_v22  ;;  %v1058_v23 = vld [vmem:[#allocation10] sm:$0xff]  ;;  %v634_v25 = vld [vmem:[%s1784_s4] sm:$0xff]  ;;  %s1516_s16 = smov 16   ;;  %s1055_s21 = sshll.u32 %s1588_s13, 3 }
  0x8b   : > { %v1065_v58 = vld [vmem:[#allocation14 + $0x8] sm:$0xff]  ;;  %v1064_v59 = vld [vmem:[#allocation14] sm:$0xff]  ;;  %s810_s30 = scalar_lea.hbm %s1873_s9, %s1055_s21  ;;  %s529_s28 = scalar_lea.vmem [#allocation16], %s1008_s1 }
  0x8c   : > { %593 = vmatpush.bf16.msra.mxu1 %v1060_v2  ;;  %627 = vmatpush.bf16.msra.mxu2 %v1062_v3  ;;  %s812_s5 = sshll.u32 %s529_s28, 4  ;;  %s814_s7 = sshll.u32 %s810_s30, 4  ;;  %s813_s5 = int_to_ptr.vmem [resolvable:$true] %s812_s5  ;;  %s815_s7 = int_to_ptr.hbm [resolvable:$true] %s814_s7 }
  0x8d   : > { %s800_s13 = scalar_lea.sflag [#allocation4], %s1763_s18  ;;  %s1435_s17 = sshra.s32 %s815_s7, 4  ;;  %s1436_s17 = int_to_ptr.hbm [resolvable:$true] %s1435_s17 }
  0x8e   : > { %559 = vmatpush.bf16.msra.mxu0 %v1058_v23  ;;  %s1437_s25 = scalar_lea.hbm %s1436_s17, 8  ;;  %s1441_s29 = scalar_lea.hbm %s1873_s9, 16 }
  0x8f   : > { %1031 = vmatmul.msk.bf16.vlgmr.msra.gmra.mxu1 %vm548_vm0, %v566_v4  ;;  %1040 = vmatmul.msk.bf16.vlgmr.msra.gmra.mxu2 %vm548_vm0, %v600_v5  ;;  %p1438_p4 = scmp.ne.s32.totalorder %s1436_s17, %s1437_s25  ;;  %p1442_p2 = scmp.lt.s32.totalorder %s1436_s17, %s1873_s9 }
  0x90   : > { %p1443_p10 = scmp.lt.s32.totalorder %s1441_s29, %s1437_s25 }
  0x91   : > { %1022 = vmatmul.msk.bf16.vlgmr.msra.gmra.mxu0 %vm548_vm0, %v531_v24  ;;  %p1439_p1 = pnand %p1438_p4, %p1647_p3 }
  0x92   : > { %p1444_p13 = por %p1443_p10, %p1442_p2 }
  0x93   : > { %p1440_p11 = pneg %p1439_p1 }
  0x95   : > { %p1445_p8 = pnand %p1444_p13, %p1440_p11 }
 0x10c   : > { %v595_v6 = vpop.f32.mrf.mxu1 }
 0x10d   : > { %v599_v7 = vpack.c.bf16 %v595_v6, %v595_v6  ;;  %v1172_v6 = vld [vmem:[%s1872_s8] ss:$0 sm:$0xff] }
 0x10e   : > { %v561_v32 = vpop.f32.mrf.mxu0 }
 0x10f   : > { %v640_v8 = vsel %vm635_vm1, %v599_v7, 0  ;;  %v695_v9 = vunpack.c.l.b16 %v599_v7  ;;  %v565_v33 = vpack.c.bf16 %v561_v32, %v561_v32 }
 0x110   : > { %649 = vmatpush.bf16.xpose.msra.mxu3 %v640_v8 }
 0x111   : > { %v696_v10 = vpack.c.b16 %v695_v9, %v695_v9  ;;  %v673_v34 = vsel %vm671_vm3, %v565_v33, 0  ;;  %v731_v46 = vunpack.c.l.b16 %v565_v33 }
 0x112   : > { %v629_v11 = vpop.f32.mrf.mxu2  ;;  %682 = vmatpush.bf16.msrb.mxu0 %v673_v34 }
 0x113   : > { %v633_v12 = vpack.c.bf16 %v629_v11, %v629_v11  ;;  %697 = vrot.lane.b32.xlu0 %v696_v10, %s1515_s15  ;;  %v732_v47 = vpack.c.b16 %v731_v46, %v731_v46 }
 0x114   : > { %v597_v13 = vpop.f32.mrf.mxu1 }
 0x115   : > { %v690_v14 = vunpack.c.l.b16 %v633_v12 }
 0x116   : > { %v563_v38 = vpop.f32.mrf.mxu0 }
 0x117   : > { %v691_v15 = vpack.c.b16 %v690_v14, %v690_v14  ;;  %1041 = vmatmul.msk.bf16.vlgmr.msra.gmra.mxu3 %vm635_vm1, %v633_v12 }
 0x118   : > { %791 = vmatpush.bf16.msrb.mxu3 %v1065_v58 }
 0x11a   : > { %v631_v16 = vpop.f32.mrf.mxu2 }
 0x11b   : > { %692 = vrot.lane.b32.xlu0 %v691_v15, %s1515_s15 }
 0x11c   : > { %792 = vmatpush.bf16.msrb.mxu3 %v1064_v59 }
 0x185   : > { %v698_v17 = vpop.permute.xlu0 %697 }
 0x186   : > { %v703_v18 = vsel %vm635_vm1, %v698_v17, 0 }
 0x187   : > { %712 = vmatpush.bf16.xpose.msrb.mxu1 %v703_v18 }
 0x18d   : > { %v693_v19 = vpop.permute.xlu0 %692 }
 0x18e   : > { %1043 = vmatmul.msk.bf16.vlgmr.msrb.gmra.mxu1 %vm635_vm1, %v693_v19 }
 0x19a   : > { %v651_v20 = vpop.f32.mrf.mxu3 }
 0x19b   : > { %v652_v29 = vadd.f32 %v651_v20, %v634_v25 }
 0x19d   : > { %v656_v31 = vsel %vm655_vm2, %v652_v29, -inf }
 0x1a2   : > { %v653_v21 = vpop.f32.mrf.mxu3 }
 0x20b   : > { %v714_v26 = vpop.f32.mrf.mxu1 }
 0x20c   : > { %v715_v27 = vadd.f32 %v714_v26, %v634_v25 }
 0x20e   : > { %v718_v28 = vsel %vm655_vm2, %v715_v27, -inf }
 0x20f   : > { %719 = vmax.xlane.f32.xlu1 %v718_v28 }
 0x213   : > { %v716_v30 = vpop.f32.mrf.mxu1 }
 0x217   : > { %657 = vmax.xlane.f32.xlu1 %v656_v31 }
 0x282   : > { %v720_v35 = vpop.xlane.xlu1 %719 }
 0x283   : > { %v721_v36 = vsub.f32 %v715_v27, %v720_v35 }
 0x285   : > { %v722_v37 = vmul.f32 1.442695, %v721_v36 }
 0x287   : > { %1173 = vpow2.f32 %v722_v37 }
 0x28a   : > { %v658_v39 = vpop.xlane.xlu1 %657 }
 0x28b   : > { %v659_v40 = vsub.f32 %v652_v29, %v658_v39 }
 0x28d   : > { %v1174_v41 = vpop.eup %1173  ;;  %v660_v42 = vmul.f32 1.442695, %v659_v40 }
 0x28e   : > { %v724_v43 = vsel %vm655_vm2, %v1174_v41, 0.0 }
 0x28f   : > { %1175 = vpow2.f32 %v660_v42  ;;  %725 = vadd.xlane.f32.xlu2 %v724_v43 }
 0x295   : > { %v1176_v44 = vpop.eup %1175 }
 0x296   : > { %v662_v45 = vsel %vm655_vm2, %v1176_v44, 0.0 }
 0x297   : > { %663 = vadd.xlane.f32.xlu0 %v662_v45 }
 0x2a7   : > { %733 = vrot.lane.b32.xlu2 %v732_v47, %s1515_s15 }
 0x302   : > { %v726_v48 = vpop.xlane.xlu2 %725 }
 0x303   : > { %1177 = vrcp.f32 %v726_v48 }
 0x309   : > { %v1178_v49 = vpop.eup %1177 }
 0x30a   : > { %v728_v50 = vmul.f32 %v1178_v49, %v1174_v41  ;;  %v664_v51 = vpop.xlane.xlu0 %663  ;;  %v734_v52 = vpop.permute.xlu2 %733 }
 0x30b   : > { %1179 = vrcp.f32 %v664_v51  ;;  %v739_v53 = vsel %vm671_vm3, %v734_v52, 0 }
 0x30c   : > { %748 = vmatpush.bf16.msrb.mxu2 %v739_v53  ;;  %v729_v54 = vpack.c.bf16 %v728_v50, %v728_v50 }
 0x30f   : > { %1044 = vmatmul.msk.bf16.vlgmr.msrb.gmra.mxu2 %vm655_vm2, %v729_v54 }
 0x311   : > { %v1180_v55 = vpop.eup %1179 }
 0x312   : > { %v666_v56 = vmul.f32 %v1180_v55, %v1176_v44 }
 0x314   : > { %v667_v57 = vpack.c.bf16 %v666_v56, %v666_v56 }
 0x316   : > { %1042 = vmatmul.msk.bf16.vlgmr.msrb.gmra.mxu0 %vm655_vm2, %v667_v57 }
 0x392   : > { %v750_v60 = vpop.f32.mrf.mxu2 }
 0x393   : > { %v754_v61 = vpack.c.bf16 %v750_v60, %v750_v60  ;;  %v684_v62 = vpop.f32.mrf.mxu0 }
 0x394   : > { %v688_v3 = vpack.c.bf16 %v684_v62, %v684_v62 }
 0x395   : > { %v756_v63 = vunpack.c.l.b16 %v754_v61 }
 0x397   : > { %v757_v0 = vpack.c.b16 %v756_v63, %v756_v63 }
 0x399   : > { %758 = vrot.lane.b32.xlu1 %v757_v0, %s1516_s16 }
 0x39a   : > { %v752_v1 = vpop.f32.mrf.mxu2 }
 0x39b   : > { %v686_v2 = vpop.f32.mrf.mxu0 }
 0x40b   : > { %v759_v4 = vpop.permute.xlu1 %758 }
 0x40c   : > { %v762_v5 = vsel %vm635_vm1, %v688_v3, %v759_v4 }
 0x40d   : > { %1053 = vmatmul.msk.bf16.vlgmr.msrb.gmra.mxu3 %vm548_vm0, %v762_v5 }
 0x490   : > { %v794_v7 = vpop.f32.mrf.mxu3 }
 0x491   : > { %v795_v8 = vadd.f32 %v1172_v6, %v794_v7 }
 0x493   : > { %798 = vst.msk [vmem:[%s529_s28] sm:$0xff] %vm548_vm0, %v795_v8 }
 0x494   : > { %1448 = shalt.err (!%p1445_p8)
}
 0x495   : > { %1090 = dma.vmem_to_hbm [thread:$0]  (%p1647_p3), %s813_s5, 128, %s815_s7, %s800_s13  }
 0x498   : > { %v796_v9 = vpop.f32.mrf.mxu3 }
 0x499 PF: > { %s1915_s18 = sld [smem:[#allocation24_spill]]  ;;  %p1917_p9 = scmp.ge.s32.totalorder %s1507_s12, 2 }
 0x49b   : > { %p1119_p12 = pnand %p1917_p9, %p1602_p6 }
 0x49d   : > { %p1120_p0 = pneg %p1119_p12 }
 0x49f   : > { %s826_s27 = sand.u32 1, %s1915_s18  }
 0x4a0   : > { %s827_s4 = scalar_lea.sflag [#allocation4], %s826_s27 }
 0x4a1   : > { %1490 = dma.done.wait (%p1120_p0), %s827_s4, 128  }
 0x4a2   : > { %1492 = vsyncadd (%p1120_p0), %s827_s4, 4294967168  ;;  %s1918_s12 = sld [smem:[#allocation27_spill]]  ;;  %s1921_s30 = smov %s1499_s10 }
 0x4a3   : > { %s1919_s15 = sld [smem:[#allocation25_spill]] }
 0x4a4   : > { %s1920_s11 = sld [smem:[#allocation28_spill]] }
 0x4a8   : > { %p30_p5 = scmp.ge.s32.totalorder %s1918_s12, 4  }
 0x4a9   : > { %s1922_s10 = smov %s1919_s15 }
 0x4aa   :  { %32 = sbr.rel (!%p30_p5) target bundleno = 17 (0x11), region = 154 }
 0x4af   :  { %833 = vsyncpa [#allocation3], 1 }
 0x4b0   :  { %835 = vsyncpa [#allocation3 + $0x1], 1 }
 0x4b1   :  { %836 = vsyncpa [#allocation6], 1 }
 0x4b2   :  { %838 = vsyncpa [#allocation6 + $0x1], 1 }
 0x4b3   :  { %839 = vsyncpa [#allocation9], 1 }
 0x4b4   :  { %841 = vsyncpa [#allocation9 + $0x1], 1 }
 0x4b5   :  { %842 = vsyncpa [#allocation12], 1 }
 0x4b6   :  { %843 = vsyncpa [#allocation15], 1 }
 0x4b7   :  { %844 = vsyncpa [#allocation4], 1 }
 0x4b8   :  { %846 = vsyncpa [#allocation4 + $0x1], 1 }

</bundles_post_ra>
